<compile_context>
chip_gen: v7x
topology: tpu7x:2x2x1
jax: 0.10.0
libtpu: 0.0.40
codegen_flags: <defaults>
</compile_context>

<pallas_src>
import jax
import jax.numpy as jnp
from jax import lax
from jax.experimental import pallas as pl
from jax.experimental.pallas import tpu as pltpu


# --------------------------------------------------------------------------- #
# Kernel (batch on the lane axis)
# --------------------------------------------------------------------------- #
def qnet_twin_duel_kernel(x_ref, w1_ref, b1_ref, w2_ref, b2_ref,
                          wo_ref, bo_ref, out_ref):
    # x_ref: [TB, S]; weights stored [out, in]; intermediates are [feat, TB].
    # h = relu(W1 @ x^T + b1): contract the shared S axis (dim 1 of both).
    h = lax.dot_general(w1_ref[...], x_ref[...],
                        dimension_numbers=(((1,), (1,)), ((), ())),
                        preferred_element_type=jnp.float32)          # [d1, TB]
    h = jnp.maximum(h + b1_ref[...], 0.0)

    s_enc = jnp.dot(w2_ref[...], h.astype(w2_ref.dtype),
                    preferred_element_type=jnp.float32) + b2_ref[...]  # [d2, TB]

    # single fused head: dueling combine + value re-norm already folded into wo/bo
    out_ref[...] = (jnp.dot(wo_ref[...], s_enc.astype(wo_ref.dtype),
                            preferred_element_type=jnp.float32)
                    + bo_ref[...]).astype(out_ref.dtype)               # [A, TB]


# --------------------------------------------------------------------------- #
# Wrapper
# --------------------------------------------------------------------------- #
def qnet_twin_duel_forward(state, fp, *, block_b=4096):
    """state: [B, state_dim] (any float dtype); fp: folded params (fold_params)."""
    B, S = state.shape
    d1, d2 = fp["w1"].shape[0], fp["w2"].shape[0]
    A = fp["wo"].shape[0]
    dtype = fp["w1"].dtype
    LANE = 128

    # tile selection: minimize padding, keep batch lane-aligned (128), and use
    # >=2 grid steps for large B so v7x can shard the "parallel" axis on 2 TCs.
    nb = max(1, -(-B // block_b))
    if B > 1024:
        nb = max(nb, 2)
    TB = ((-(-B // nb) + LANE - 1) // LANE) * LANE
    Bp = TB * nb

    # NOTE: in a real pipeline the caller should already produce bf16 state so
    # this cast fuses upstream instead of adding an extra HBM pass here.
    x = state.astype(dtype)
    if Bp != B:
        x = jnp.pad(x, ((0, Bp - B), (0, 0)))

    def resident(arr):  # full-array block, constant index -> stays VMEM-resident
        return pl.BlockSpec(arr.shape, lambda i: (0, 0))

    flops = 2 * Bp * (S * d1 + d1 * d2 + d2 * A)
    bytes_accessed = (x.size * x.dtype.itemsize + Bp * A * 4
                      + sum(int(v.size) * v.dtype.itemsize for v in fp.values()))

    out = pl.pallas_call(
        qnet_twin_duel_kernel,
        out_shape=jax.ShapeDtypeStruct((A, Bp), jnp.float32),
        grid=(nb,),
        in_specs=[
            pl.BlockSpec((TB, S), lambda i: (i, 0)),   # state tile (batch on rows)
            resident(fp["w1"]), resident(fp["b1"]),
            resident(fp["w2"]), resident(fp["b2"]),
            resident(fp["wo"]), resident(fp["bo"]),
        ],
        out_specs=pl.BlockSpec((A, TB), lambda i: (0, i)),   # lane-dense store
        compiler_params=pltpu.CompilerParams(
            dimension_semantics=("parallel",),
            vmem_limit_bytes=32 * 1024 * 1024),
        cost_estimate=pl.CostEstimate(
            flops=flops, transcendentals=0, bytes_accessed=bytes_accessed),
    )(x, fp["w1"], fp["b1"], fp["w2"], fp["b2"], fp["wo"], fp["bo"])

    return out[:, :B].T   # [B, action_dim], matching the PyTorch module


# --------------------------------------------------------------------------- #
# Offline parameter folding (one-time, not per call)
# --------------------------------------------------------------------------- #
def fold_params(p, *, dtype=jnp.float32):
    """Fold state-norm, dueling combine and value re-norm into the weights.
    Weights are returned [out, in] for the batch-on-lanes kernel; biases stay f32."""
    # (x - avg)/std @ W1 + b1  ==  x @ (W1/std[:,None]) + (b1 - (avg/std) @ W1)
    inv_std = 1.0 / p["state_std"]                                     # [1, S]
    w1 = (p["w1"] * inv_std.T).T                                       # [d1, S]
    b1 = (p["b1"] - (p["state_avg"] * inv_std) @ p["w1"]).T            # [d1, 1]

    w2 = p["w2"].T                                                     # [d2, d1]
    b2 = p["b2"].T                                                     # [d2, 1]

    # (q_val - mean_j(q_val) + q_adv) * vstd + vavg
    #   == s @ ((Wval - mean_j Wval + Wadv) * vstd)
    #      + (bval - mean(bval) + badv) * vstd + vavg
    vstd = p["value_std"][0, 0]
    vavg = p["value_avg"][0, 0]
    w_out = (p["wval"] - p["wval"].mean(axis=1, keepdims=True)
             + p["wadv"]) * vstd                                       # [d2, A]
    b_out = (p["bval"] - p["bval"].mean() + p["badv"]) * vstd + vavg   # [1, A]

    return {"w1": w1.astype(dtype), "b1": b1.astype(jnp.float32),
            "w2": w2.astype(dtype), "b2": b2.astype(jnp.float32),
            "wo": w_out.T.astype(dtype), "bo": b_out.T.astype(jnp.float32)}


# --------------------------------------------------------------------------- #
# Parameter construction (mirrors the PyTorch module's init) + reference
# --------------------------------------------------------------------------- #
def _orthogonal(key, shape, gain):
    rows, cols = shape
    n = max(rows, cols)
    a = jax.random.normal(key, (n, n), dtype=jnp.float32)
    q, r = jnp.linalg.qr(a)
    q = q * jnp.sign(jnp.diag(r))
    return gain * q[:rows, :cols]


def make_params(key, state_dim, dims, action_dim):
    d1, d2 = dims
    keys = jax.random.split(key, 4)

    def linear(k, fan_in, fan_out):
        bound = 1.0 / jnp.sqrt(fan_in)
        kw, kb = jax.random.split(k)
        w = jax.random.uniform(kw, (fan_in, fan_out), jnp.float32, -bound, bound)
        b = jax.random.uniform(kb, (1, fan_out), jnp.float32, -bound, bound)
        return w, b

    w1, b1 = linear(keys[0], state_dim, d1)
    w2, b2 = linear(keys[1], d1, d2)
    wval = _orthogonal(keys[2], (action_dim, d2), 0.1).T   # stored [in, out]
    wadv = _orthogonal(keys[3], (1, d2), 0.1).T
    bval = jnp.full((1, action_dim), 1e-6, jnp.float32)
    badv = jnp.full((1, 1), 1e-6, jnp.float32)

    return {
        "state_avg": jnp.zeros((1, state_dim), jnp.float32),
        "state_std": jnp.ones((1, state_dim), jnp.float32),
        "value_avg": jnp.zeros((1, 1), jnp.float32),
        "value_std": jnp.ones((1, 1), jnp.float32),
        "w1": w1, "b1": b1, "w2": w2, "b2": b2,
        "wval": wval, "bval": bval, "wadv": wadv, "badv": badv,
    }


def reference_forward(state, p):
    x = (state - p["state_avg"]) / p["state_std"]
    h = jnp.maximum(x @ p["w1"] + p["b1"], 0.0)
    s = h @ p["w2"] + p["b2"]
    qv = s @ p["wval"] + p["bval"]
    qa = s @ p["wadv"] + p["badv"]
    v = qv - qv.mean(axis=1, keepdims=True) + qa
    return v * p["value_std"][0, 0] + p["value_avg"][0, 0]


# --------------------------------------------------------------------------- #
# TODO(synk): get_q1_q2 / get_action paths of the module are not implemented;
# only forward() (the spec'd pass) is ported.
if __name__ == "__main__":
    B, state_dim, dims, action_dim = 8, 16, [32, 32], 4

    key = jax.random.PRNGKey(0)
    k_state, k_params, k_norm = jax.random.split(key, 3)
    state = jax.random.normal(k_state, (B, state_dim), dtype=jnp.float32)
    params = make_params(k_params, state_dim, dims, action_dim)

    # non-trivial running-norm stats so the offline folding is actually exercised
    kn1, kn2, kn3, kn4 = jax.random.split(k_norm, 4)
    params["state_avg"] = 0.1 * jax.random.normal(kn1, (1, state_dim), jnp.float32)
    params["state_std"] = 1.0 + jax.random.uniform(kn2, (1, state_dim), jnp.float32)
    params["value_avg"] = 0.1 * jax.random.normal(kn3, (1, 1), jnp.float32)
    params["value_std"] = 1.0 + jax.random.uniform(kn4, (1, 1), jnp.float32)

    ref = reference_forward(state, params)

    # exact-f32 path: tight tolerance
    out_f32 = jax.block_until_ready(
        qnet_twin_duel_forward(state, fold_params(params, dtype=jnp.float32)))
    assert out_f32.shape == (B, action_dim)
    assert jnp.allclose(out_f32, ref, atol=1e-4, rtol=1e-4), "f32 mismatch vs reference"

    # bf16 fast path (bf16 weights/x, f32 accumulation): looser tolerance
    out_bf16 = jax.block_until_ready(
        qnet_twin_duel_forward(state, fold_params(params, dtype=jnp.bfloat16)))
    assert out_bf16.shape == (B, action_dim)
    assert jnp.allclose(out_bf16, ref, atol=5e-2, rtol=5e-2), "bf16 mismatch vs reference"

    print("KERNEL_OK")
</pallas_src>

<mosaic_0001>
module attributes {stable_mosaic.version = 11 : i64} {
  func.func @qnet_twin_duel_kernel(%arg0: i32, %arg1: memref<128x16xf32, #tpu.memory_space<vmem>>, %arg2: memref<32x16xf32, #tpu.memory_space<vmem>>, %arg3: memref<32x1xf32, #tpu.memory_space<vmem>>, %arg4: memref<32x32xf32, #tpu.memory_space<vmem>>, %arg5: memref<32x1xf32, #tpu.memory_space<vmem>>, %arg6: memref<4x32xf32, #tpu.memory_space<vmem>>, %arg7: memref<4x1xf32, #tpu.memory_space<vmem>>, %arg8: memref<4x128xf32, #tpu.memory_space<vmem>>) attributes {dimension_semantics = [#tpu.dimension_semantics<parallel>], iteration_bounds = array<i64: 1>, scalar_prefetch = 0 : i64, scratch_operands = 0 : i64, tpu.core_type = #tpu.core_type<tc>, window_params = [{transform_indices = @transform_0, window_bounds = array<i64: 128, 16>}, {pipeline_mode = #tpu.pipeline_mode<synchronous>, transform_indices = @transform_1, window_bounds = array<i64: 32, 16>}, {pipeline_mode = #tpu.pipeline_mode<synchronous>, transform_indices = @transform_2, window_bounds = array<i64: 32, 1>}, {pipeline_mode = #tpu.pipeline_mode<synchronous>, transform_indices = @transform_3, window_bounds = array<i64: 32, 32>}, {pipeline_mode = #tpu.pipeline_mode<synchronous>, transform_indices = @transform_4, window_bounds = array<i64: 32, 1>}, {pipeline_mode = #tpu.pipeline_mode<synchronous>, transform_indices = @transform_5, window_bounds = array<i64: 4, 32>}, {pipeline_mode = #tpu.pipeline_mode<synchronous>, transform_indices = @transform_6, window_bounds = array<i64: 4, 1>}, {transform_indices = @transform_7, window_bounds = array<i64: 4, 128>}]} {
    %c0 = arith.constant 0 : index
    %c0_0 = arith.constant 0 : index
    %0 = vector.load %arg2[%c0, %c0_0] : memref<32x16xf32, #tpu.memory_space<vmem>>, vector<32x16xf32>
    %c0_1 = arith.constant 0 : index
    %c0_2 = arith.constant 0 : index
    %1 = vector.load %arg1[%c0_1, %c0_2] : memref<128x16xf32, #tpu.memory_space<vmem>>, vector<128x16xf32>
    %cst = arith.constant dense<0.000000e+00> : vector<32x128xf32>
    %2 = tpu.matmul %0, %1, %cst {dimension_numbers = #tpu.dot_dimension_numbers<[1], [1], [0], [0], [0, 0, 1, 0], [], []>} : vector<32x16xf32>, vector<128x16xf32>, vector<32x128xf32> -> vector<32x128xf32>
    %c0_3 = arith.constant 0 : index
    %c0_4 = arith.constant 0 : index
    %3 = vector.load %arg3[%c0_3, %c0_4] : memref<32x1xf32, #tpu.memory_space<vmem>>, vector<32x1xf32>
    %4 = vector.broadcast %3 : vector<32x1xf32> to vector<32x128xf32>
    %5 = arith.addf %2, %4 : vector<32x128xf32>
    %cst_5 = arith.constant 0.000000e+00 : f32
    %6 = vector.broadcast %cst_5 : f32 to vector<32x128xf32>
    %7 = arith.maximumf %5, %6 : vector<32x128xf32>
    %c0_6 = arith.constant 0 : index
    %c0_7 = arith.constant 0 : index
    %8 = vector.load %arg4[%c0_6, %c0_7] : memref<32x32xf32, #tpu.memory_space<vmem>>, vector<32x32xf32>
    %cst_8 = arith.constant dense<0.000000e+00> : vector<32x128xf32>
    %9 = tpu.matmul %8, %7, %cst_8 {dimension_numbers = #tpu.dot_dimension_numbers<[1], [0], [0], [1], [0, 0, 1, 1], [], []>} : vector<32x32xf32>, vector<32x128xf32>, vector<32x128xf32> -> vector<32x128xf32>
    %c0_9 = arith.constant 0 : index
    %c0_10 = arith.constant 0 : index
    %10 = vector.load %arg5[%c0_9, %c0_10] : memref<32x1xf32, #tpu.memory_space<vmem>>, vector<32x1xf32>
    %11 = vector.broadcast %10 : vector<32x1xf32> to vector<32x128xf32>
    %12 = arith.addf %9, %11 : vector<32x128xf32>
    %c0_11 = arith.constant 0 : index
    %c0_12 = arith.constant 0 : index
    %13 = vector.load %arg6[%c0_11, %c0_12] : memref<4x32xf32, #tpu.memory_space<vmem>>, vector<4x32xf32>
    %cst_13 = arith.constant dense<0.000000e+00> : vector<4x128xf32>
    %14 = tpu.matmul %13, %12, %cst_13 {dimension_numbers = #tpu.dot_dimension_numbers<[1], [0], [0], [1], [0, 0, 1, 1], [], []>} : vector<4x32xf32>, vector<32x128xf32>, vector<4x128xf32> -> vector<4x128xf32>
    %c0_14 = arith.constant 0 : index
    %c0_15 = arith.constant 0 : index
    %15 = vector.load %arg7[%c0_14, %c0_15] : memref<4x1xf32, #tpu.memory_space<vmem>>, vector<4x1xf32>
    %16 = vector.broadcast %15 : vector<4x1xf32> to vector<4x128xf32>
    %17 = arith.addf %14, %16 : vector<4x128xf32>
    %c0_16 = arith.constant 0 : index
    %c0_17 = arith.constant 0 : index
    %18 = vector.load %arg8[%c0_16, %c0_17] : memref<4x128xf32, #tpu.memory_space<vmem>>, vector<4x128xf32>
    tpu.vector_store %arg8[%c0_16, %c0_17], %17 {strides = array<i32>} : memref<4x128xf32, #tpu.memory_space<vmem>>, vector<4x128xf32>,
    return
  }
  func.func @transform_0(%arg0: i32) -> (i32, i32) {
    %c0_i32 = arith.constant 0 : i32
    %c0_i32_0 = arith.constant 0 : i32
    return %arg0, %c0_i32 : i32, i32
  }
  func.func @transform_1(%arg0: i32) -> (i32, i32) {
    %c0_i32 = arith.constant 0 : i32
    %c0_i32_0 = arith.constant 0 : i32
    %c0_i32_1 = arith.constant 0 : i32
    return %c0_i32, %c0_i32_0 : i32, i32
  }
  func.func @transform_2(%arg0: i32) -> (i32, i32) {
    %c0_i32 = arith.constant 0 : i32
    %c0_i32_0 = arith.constant 0 : i32
    %c0_i32_1 = arith.constant 0 : i32
    return %c0_i32, %c0_i32_0 : i32, i32
  }
  func.func @transform_3(%arg0: i32) -> (i32, i32) {
    %c0_i32 = arith.constant 0 : i32
    %c0_i32_0 = arith.constant 0 : i32
    %c0_i32_1 = arith.constant 0 : i32
    return %c0_i32, %c0_i32_0 : i32, i32
  }
  func.func @transform_4(%arg0: i32) -> (i32, i32) {
    %c0_i32 = arith.constant 0 : i32
    %c0_i32_0 = arith.constant 0 : i32
    %c0_i32_1 = arith.constant 0 : i32
    return %c0_i32, %c0_i32_0 : i32, i32
  }
  func.func @transform_5(%arg0: i32) -> (i32, i32) {
    %c0_i32 = arith.constant 0 : i32
    %c0_i32_0 = arith.constant 0 : i32
    %c0_i32_1 = arith.constant 0 : i32
    return %c0_i32, %c0_i32_0 : i32, i32
  }
  func.func @transform_6(%arg0: i32) -> (i32, i32) {
    %c0_i32 = arith.constant 0 : i32
    %c0_i32_0 = arith.constant 0 : i32
    %c0_i32_1 = arith.constant 0 : i32
    return %c0_i32, %c0_i32_0 : i32, i32
  }
  func.func @transform_7(%arg0: i32) -> (i32, i32) {
    %c0_i32 = arith.constant 0 : i32
    %c0_i32_0 = arith.constant 0 : i32
    return %c0_i32, %arg0 : i32, i32
  }
}

</mosaic_0001>

<bundles_post_ra>
// kernel: tpu_custom_call.1
= control target key start
LH: loop header
LB: loop body
LE: loop exit
PB: predicated region body
PF: predicated region fallthrough
CT: control target
= control target key end

     0   :  { %vm71_vm0 = vcmask 130048   ;;  %v656_v6 = vmov 0   ;;  %s862_s0 = inlined_call_operand.vmem [shape: f32[128,16], index: 0, kind: input, shape index: {}]   ;;  %s863_s1 = inlined_call_operand.vmem [shape: f32[32,16], index: 1, kind: input, shape index: {}]   ;;  %s864_s2 = inlined_call_operand.vmem [shape: f32[32,1], index: 2, kind: input, shape index: {}]   ;;  %s865_s3 = inlined_call_operand.vmem [shape: f32[32,32], index: 3, kind: input, shape index: {}]   ;;  %s866_s4 = inlined_call_operand.vmem [shape: f32[32,1], index: 4, kind: input, shape index: {}]   ;;  %s867_s5 = inlined_call_operand.vmem [shape: f32[4,32], index: 5, kind: input, shape index: {}]   ;;  %s868_s6 = inlined_call_operand.vmem [shape: f32[4,1], index: 6, kind: input, shape index: {}]   ;;  %s869_s7 = inlined_call_operand.hbm [shape: f32[4,128], index: 7, kind: output, shape index: {}]  }
   0x1   :  { %v31_v0 = vld [vmem:[%s862_s0] sm:$0xff]  ;;  %v32_v1 = vld [vmem:[%s862_s0 + $0x8] sm:$0xff]  ;;  %v33_v2 = vld [vmem:[%s862_s0 + $0x10] sm:$0xff]  ;;  %630 = vset.pattern.permute.xlu0 %v656_v6  ;;  %631 = vset.pattern.permute.xlu1 %v656_v6 }
   0x2   :  { %v563_v3 = vpack.c.bf16 %v32_v1, %v31_v0  ;;  %vm712_vm1 = vmpackc.low %vm71_vm0, %vm71_vm0  ;;  %v34_v5 = vld [vmem:[%s862_s0 + $0x18] sm:$0xff]  ;;  %v27_v8 = vld [vmem:[%s863_s1] sm:$0xff] }
   0x3   :  { %v569_v7 = vpack.c.bf16 %v34_v5, %v33_v2  ;;  %v35_v9 = vld [vmem:[%s862_s0 + $0x20] sm:$0xff]  ;;  %v36_v10 = vld [vmem:[%s862_s0 + $0x28] sm:$0xff]  ;;  %532 = vmatprep.mubr.msk.f32.mxu0 %vm71_vm0, %v27_v8  ;;  %v49_v12 = vld [vmem:[%s864_s2 + $0x10] sm:$0xff] }
   0x4   :  { %565 = vmatprep.subr.msk.bf16.mxu0 %vm712_vm1, %v563_v3  ;;  %v47_v11 = vld [vmem:[%s864_s2] sm:$0xff]  ;;  %63 = vperm.xlu1 %631, %v49_v12   ;;  %v575_v13 = vpack.c.bf16 %v36_v10, %v35_v9  ;;  %v48_v14 = vld [vmem:[%s864_s2 + $0x8] sm:$0xff]  ;;  %v50_v15 = vld [vmem:[%s864_s2 + $0x18] sm:$0xff] }
   0x5   :  { %568 = vmatpush3.bf16.xpose.msk.msra.mxu0 %vm712_vm1, %v563_v3  ;;  %53 = vperm.xlu0 %630, %v47_v11  }
   0x6   :  { %571 = vmatprep.subr.msk.bf16.mxu0 %vm712_vm1, %v569_v7 }
   0x7   :  { %12 = vsyncpa [#allocation3], 0  ;;  %v225_v16 = vld [vmem:[%s866_s4] sm:$0xff]  ;;  %v37_v17 = vld [vmem:[%s862_s0 + $0x30] sm:$0xff]  ;;  %vm249_vm2 = vcmask 261120   ;;  %v657_v61 = vmov 0.0|0.0  }
   0x8   :  { %68 = vperm.xlu1 %631, %v50_v15   ;;  %v38_v18 = vld [vmem:[%s862_s0 + $0x38] sm:$0xff]  ;;  %v226_v19 = vld [vmem:[%s866_s4 + $0x8] sm:$0xff]  ;;  %v227_v21 = vld [vmem:[%s866_s4 + $0x10] sm:$0xff]  ;;  %vm658_vm3 = vmmov 0   ;;  %v659_v62 = vmov 0.0   ;;  %s660_s16 = smov [#allocation2]  }
   0x9   :  { %58 = vperm.xlu0 %630, %v48_v14   ;;  %v581_v20 = vpack.c.bf16 %v38_v18, %v37_v17  ;;  %v228_v22 = vld [vmem:[%s866_s4 + $0x18] sm:$0xff]  ;;  %v348_v23 = vld [vmem:[%s868_s6] sm:$0xf]  ;;  %v40_v25 = vld [vmem:[%s862_s0 + $0x48] sm:$0xff]  ;;  %s434_s4 = sshll.u32 %s660_s16, 4  ;;  %s435_s4 = int_to_ptr.vmem [resolvable:$true] %s434_s4 }
   0xa   :  { %v39_v24 = vld [vmem:[%s862_s0 + $0x40] sm:$0xff]  ;;  %v41_v27 = vld [vmem:[%s862_s0 + $0x50] sm:$0xff]  ;;  %v42_v28 = vld [vmem:[%s862_s0 + $0x58] sm:$0xff]  ;;  %s632_s17 = scalar_lea.vmem %s435_s4, 64  ;;  %p637_p1 = scmp.lt.s32.totalorder %s435_s4, %s435_s4 }
   0xb   :  { %v587_v26 = vpack.c.bf16 %v40_v25, %v39_v24  ;;  %v593_v29 = vpack.c.bf16 %v42_v28, %v41_v27  ;;  %v43_v30 = vld [vmem:[%s862_s0 + $0x60] sm:$0xff]  ;;  %v44_v31 = vld [vmem:[%s862_s0 + $0x68] sm:$0xff]  ;;  %v45_v33 = vld [vmem:[%s862_s0 + $0x70] sm:$0xff]  ;;  %p633_p0 = scmp.ne.s32.totalorder %s435_s4, %s632_s17  ;;  %p638_p2 = scmp.lt.s32.totalorder %s632_s17, %s632_s17 }
   0xc   :  { %236 = vperm.xlu1 %631, %v226_v19   ;;  %v599_v32 = vpack.c.bf16 %v44_v31, %v43_v30  ;;  %v46_v34 = vld [vmem:[%s862_s0 + $0x78] sm:$0xff]  ;;  %v28_v36 = vld [vmem:[%s863_s1 + $0x8] sm:$0xff]  ;;  %v29_v37 = vld [vmem:[%s863_s1 + $0x10] sm:$0xff] }
   0xd   :  { %574 = vmatpush3.bf16.xpose.msk.msra.mxu0 %vm712_vm1, %v569_v7  ;;  %231 = vperm.xlu0 %630, %v225_v16   ;;  %v605_v35 = vpack.c.bf16 %v46_v34, %v45_v33  ;;  %v30_v38 = vld [vmem:[%s863_s1 + $0x18] sm:$0xff]  ;;  %v221_v39 = vld [vmem:[%s865_s3] sm:$0xff]  ;;  %v222_v58 = vld [vmem:[%s865_s3 + $0x8] sm:$0xff]  ;;  %p639_p3 = por %p638_p2, %p637_p1 }
   0xe   :  { %577 = vmatprep.subr.msk.bf16.mxu0 %vm712_vm1, %v575_v13  ;;  %546 = vmatprep.mubr.msk.f32.mxu1 %vm249_vm2, %v221_v39  ;;  %v223_v59 = vld [vmem:[%s865_s3 + $0x10] sm:$0xff]  ;;  %v224_v60 = vld [vmem:[%s865_s3 + $0x18] sm:$0xff] }
   0xf   :  { %p640_p4 = pnand %p639_p3, %p633_p0 }
  0x10   :  { %246 = vperm.xlu1 %631, %v228_v22  }
  0x11   :  { %241 = vperm.xlu0 %630, %v227_v21  }
  0x15   :  { %580 = vmatpush3.bf16.xpose.msk.msra.mxu0 %vm712_vm1, %v575_v13  ;;  %351 = vperm.xlu0 %630, %v348_v23   ;;  %v347_v13 = vld [vmem:[%s867_s5] sm:$0xf] }
  0x16   :  { %583 = vmatprep.subr.msk.bf16.mxu0 %vm712_vm1, %v581_v20 }
  0x1d   :  { %586 = vmatpush3.bf16.xpose.msk.msra.mxu0 %vm712_vm1, %v581_v20 }
  0x1e   :  { %589 = vmatprep.subr.msk.bf16.mxu0 %vm712_vm1, %v587_v26 }
  0x25   :  { %592 = vmatpush3.bf16.xpose.msk.msra.mxu0 %vm712_vm1, %v587_v26 }
  0x26   :  { %595 = vmatprep.subr.msk.bf16.mxu0 %vm712_vm1, %v593_v29 }
  0x2d   :  { %598 = vmatpush3.bf16.xpose.msk.msra.mxu0 %vm712_vm1, %v593_v29 }
  0x2e   :  { %601 = vmatprep.subr.msk.bf16.mxu0 %vm712_vm1, %v599_v32 }
  0x35   :  { %604 = vmatpush3.bf16.xpose.msk.msra.mxu0 %vm712_vm1, %v599_v32 }
  0x36   :  { %607 = vmatprep.subr.msk.bf16.mxu0 %vm712_vm1, %v605_v35 }
  0x3d   :  { %610 = vmatpush3.bf16.xpose.msk.msra.mxu0 %vm712_vm1, %v605_v35 }
  0x44   :  { %533 = vmatmul.mubr.msk.f32.vlgmr.msra.gmra.mrb[0].mxu0 %vm71_vm0, %v28_v36 }
  0x45   :  { %535 = vmatprep.mubr.msk.f32.mxu0 %vm71_vm0, %v29_v37 }
  0x48   :  { %536 = vmatmul.mubr.msk.f32.gmra.mrb[2].mxu0 %vm71_vm0, %v30_v38 }
  0x83   :  { %v64_v41 = vpop.permute.xlu1 %63 }
  0x84   :  { %v54_v40 = vpop.permute.xlu0 %53 }
  0x87   :  { %v69_v48 = vpop.permute.xlu1 %68 }
  0x88   :  { %v59_v42 = vpop.permute.xlu0 %58 }
  0x8b   :  { %v237_v63 = vpop.permute.xlu1 %236 }
  0x8c   :  { %v232_v0 = vpop.permute.xlu0 %231 }
  0x8f   :  { %v247_v5 = vpop.permute.xlu1 %246 }
  0x90   :  { %v242_v8 = vpop.permute.xlu0 %241 }
  0x94   :  { %v352_v14 = vpop.permute.xlu0 %351 }
 0x117   :  { %v534_v43 = vpop.f32.mrb[0].mxu0 }
 0x118   :  { %v204_v44 = vadd.f32 %v534_v43, %v59_v42  ;;  %v198_v45 = vpop.f32.mrb[1].mxu0 }
 0x119   :  { %v199_v46 = vadd.f32 %v198_v45, %v54_v40 }
 0x11a   :  { %v218_v47 = vmax.f32 %v204_v44, 0.0 }
 0x11b   :  { %v217_v49 = vmax.f32 %v199_v46, 0.0  ;;  %v537_v50 = vpop.f32.mrb[2].mxu0 }
 0x11c   :  { %v214_v51 = vadd.f32 %v537_v50, %v69_v48  ;;  %v208_v52 = vpop.f32.mrb[3].mxu0 }
 0x11d   :  { %v209_v53 = vadd.f32 %v208_v52, %v64_v41  ;;  %v611_v54 = vpack.c.bf16 %v218_v47, %v217_v49 }
 0x11e   :  { %v220_v55 = vmax.f32 %v214_v51, 0.0 }
 0x11f   :  { %v219_v56 = vmax.f32 %v209_v53, 0.0  ;;  %612 = vmatprep.subr.bf16.mxu1 %v611_v54 }
 0x120   :  { %614 = vmatpush3.bf16.msra.mxu1 %v611_v54 }
 0x121   :  { %v615_v57 = vpack.c.bf16 %v220_v55, %v219_v56 }
 0x123   :  { %616 = vmatprep.subr.bf16.mxu1 %v615_v57 }
 0x124   :  { %618 = vmatpush3.bf16.msra.mxu1 %v615_v57 }
 0x125   :  { %619 = vmatprep.subr.bf16.mxu1 %v657_v61 }
 0x127   :  { %547 = vmatmul.mubr.msk.f32.vlgmr.msra.gmra.mrb[0].mxu1 %vm249_vm2, %v222_v58 }
 0x128   :  { %549 = vmatprep.mubr.msk.f32.mxu1 %vm249_vm2, %v223_v59 }
 0x12b   :  { %550 = vmatmul.mubr.msk.f32.gmra.mrb[2].mxu1 %vm249_vm2, %v224_v60 }
 0x12c   :  { %560 = vmatprep.mubr.msk.f32.mxu1 %vm658_vm3, %v659_v62 }
 0x1fa   :  { %v548_v1 = vpop.f32.mrb[0].mxu1 }
 0x1fb   :  { %v334_v2 = vadd.f32 %v548_v1, %v237_v63  ;;  %v328_v3 = vpop.f32.mrb[1].mxu1 }
 0x1fc   :  { %v329_v4 = vadd.f32 %v328_v3, %v232_v0 }
 0x1fe   :  { %v620_v6 = vpack.c.bf16 %v334_v2, %v329_v4  ;;  %v551_v7 = vpop.f32.mrb[2].mxu1 }
 0x1ff   :  { %v344_v9 = vadd.f32 %v551_v7, %v247_v5  ;;  %v338_v10 = vpop.f32.mrb[3].mxu1 }
 0x200   :  { %v339_v11 = vadd.f32 %v338_v10, %v242_v8  ;;  %621 = vmatpush3.bf16.msra.mxu1 %v620_v6 }
 0x201   :  { %622 = vmatprep.subr.bf16.mxu1 %v657_v61 }
 0x202   :  { %v623_v12 = vpack.c.bf16 %v344_v9, %v339_v11 }
 0x204   :  { %624 = vmatpush3.bf16.msra.mxu1 %v623_v12 }
 0x207   :  { %561 = vmatmul.mubr.msk.f32.vlgmr.msra.gmra.mrb[4].mxu1 %vm249_vm2, %v347_v13 }
 0x2da   :  { %v423_v15 = vpop.f32.mrb[4].mxu1 }
 0x2db   :  { %v424_v16 = vadd.f32 %v423_v15, %v352_v14  ;;  %v562_v17 = vpop.f32.mrb[5].mxu1 }
 0x2dd   :  { %427 = vst [vmem:[#allocation2] sm:$0xf] %v424_v16 }
 0x2de   :  { %643 = shalt.err (!%p640_p4)
}
 0x2df   :  { %s644_s5 = scalar_lea.hbm %s869_s7, 64 }
 0x2e0   :  { %p645_p5 = scmp.ne.s32.totalorder %s869_s7, %s644_s5  ;;  %p648_p6 = scmp.lt.u32.totalorder %s644_s5, %s869_s7 }
 0x2e2   :  { %p650_p7 = pnand %p648_p6, %p645_p5 }
 0x2e4   :  { %653 = shalt.err (!%p650_p7)
}
 0x2e5   :  { %437 = dma.vmem_to_hbm [thread:$0]  %s435_s4, 64, %s869_s7, [#allocation3]  }
 0x2e6   :  { %654 = dma.done.wait [#allocation3], 64  }
 0x2e7   :  { %655 = vsyncadd [#allocation3], 4294967232 }
 0x2e8   :  { %441 = vsyncpa [#allocation3], 1 }

</bundles_post_ra>
